<compile_context>
chip_gen: v6e
topology: v6e:2x2x1
jax: 0.10.0
libtpu: 0.0.40
codegen_flags: <defaults>
</compile_context>

<pallas_src>
import functools

import jax
import jax.numpy as jnp
from jax.experimental import pallas as pl
from jax.experimental.pallas import tpu as pltpu


def enet_weighing(labels, num_classes, c=1.02):
    """ENet class weighting: w[k] = 1 / ln(c + count_k / total_pixels)."""
    # TODO(synk): the reference repo's enet_weighing() body is not included in the
    # spec; this is the canonical ENet formula over the current label batch
    # (ignore pixels excluded from class counts, included in the total).
    flat = labels.reshape(-1).astype(jnp.int32)
    in_range = (flat >= 0) & (flat < num_classes)
    remapped = jnp.where(in_range, flat, num_classes)        # ignore -> extra bin
    counts = jnp.bincount(remapped, length=num_classes + 1)[:num_classes]
    propensity = counts.astype(jnp.float32) / jnp.float32(flat.size)
    return 1.0 / jnp.log(c + propensity)


def _weighted_ce_kernel(w_ref, logits_ref, tgt_ref, loss_ref, *, num_classes):
    """Per-pixel weighted CE (reduction='none', ignore_index) on one (TR, 128) pixel tile.

    Fused structure: pass 1 running max over the C class slabs; pass 2 sum-exp
    plus target/weight gather on the raw logits -- all VPU-elementwise on dense
    (TR,128) f32 slabs, no materialized (C,TR,128) temporary.  The ignore label
    never matches any class k, so w_pix stays 0 there and the stored loss is
    exactly 0 without an explicit valid mask.
    """
    t = tgt_ref[0]                                        # (TR, 128) int32

    # Pass 1: running max over the class slabs.
    m = logits_ref[0, 0].astype(jnp.float32)              # (TR, 128)
    for k in range(1, num_classes):
        m = jnp.maximum(m, logits_ref[0, k].astype(jnp.float32))

    # Pass 2: fused sum-exp + target/weight gather (unrolled; C is static & small).
    s = jnp.zeros_like(m)
    x_t = jnp.zeros_like(m)
    w_pix = jnp.zeros_like(m)
    for k in range(num_classes):
        xk = logits_ref[0, k].astype(jnp.float32)
        s = s + jnp.exp(xk - m)
        hit = t == k                                       # ignore_label never matches
        x_t = jnp.where(hit, xk, x_t)
        w_pix = jnp.where(hit, w_ref[k], w_pix)            # scalar SMEM splat

    ce = (m - x_t) + jnp.log(s)                            # -log softmax[target]
    loss_ref[0] = w_pix * ce                               # 0 at ignore / padded pixels


def weighted_ce_loss_map(logits, labels, class_weights, ignore_label,
                         target_block_bytes=8 * 1024 * 1024):
    """logits (N,C,H,W), labels (N,H,W) int, class_weights (C,) f32 ->
    per-pixel weighted CE loss (N,H,W) f32 (0 at ignore pixels)."""
    N, C, H, W = logits.shape
    HW = H * W
    x = logits.reshape(N, C, HW)                       # contiguous: no transpose
    t = labels.reshape(N, HW).astype(jnp.int32)

    # Pixel tiling: rows of 128 lanes; TR rows per block (multiple of 8 or the
    # full row count for tiny inputs).  Sized by the f32 *working set* (4 B per
    # element regardless of input dtype) so bf16 inputs don't overshoot VMEM
    # after the in-kernel upcast.
    tr_cap = target_block_bytes // (C * 128 * 4)
    tr_cap = max(8, min(2048, (tr_cap // 8) * 8))
    R = (HW + 127) // 128
    TR = R if R <= tr_cap else tr_cap
    R_pad = ((R + TR - 1) // TR) * TR
    HW_pad = R_pad * 128

    if HW_pad != HW:
        x = jnp.pad(x, ((0, 0), (0, 0), (0, HW_pad - HW)))
        t = jnp.pad(t, ((0, 0), (0, HW_pad - HW)), constant_values=ignore_label)

    x = x.reshape(N, C, R_pad, 128)
    t = t.reshape(N, R_pad, 128)
    w = class_weights.astype(jnp.float32)              # (C,) -> SMEM, scalar splats

    kern = functools.partial(_weighted_ce_kernel, num_classes=C)
    loss = pl.pallas_call(
        kern,
        out_shape=jax.ShapeDtypeStruct((N, R_pad, 128), jnp.float32),
        grid=(N, R_pad // TR),
        in_specs=[
            pl.BlockSpec(memory_space=pltpu.MemorySpace.SMEM),
            pl.BlockSpec((1, C, TR, 128), lambda n, r: (n, 0, r, 0)),
            pl.BlockSpec((1, TR, 128), lambda n, r: (n, r, 0)),
        ],
        out_specs=pl.BlockSpec((1, TR, 128), lambda n, r: (n, r, 0)),
        compiler_params=pltpu.CompilerParams(
            dimension_semantics=("parallel", "parallel"),
            vmem_limit_bytes=48 * 1024 * 1024,
        ),
    )(w, x, t)

    return loss.reshape(N, HW_pad)[:, :HW].reshape(N, H, W)


@functools.partial(jax.jit, static_argnames=("thresh", "n_min", "num_classes", "ignore_lb"))
def _weighted_ohem_forward(logits, labels, *, thresh, n_min, num_classes, ignore_lb):
    class_w = enet_weighing(labels, num_classes)
    loss = weighted_ce_loss_map(logits, labels, class_w, ignore_lb).reshape(-1)
    P = loss.shape[0]

    # PyTorch: sort desc; if loss_sorted[n_min] > thresh keep loss > thresh,
    # else keep top n_min; mean.  The branch condition is equivalent to
    # count(loss > thresh) > n_min, so the expensive top_k fallback only runs
    # (via lax.cond) when the threshold branch is NOT taken.
    hard = loss > thresh
    n_hard = jnp.sum(hard)

    def mean_hard(_):
        return jnp.sum(jnp.where(hard, loss, 0.0)) / jnp.maximum(
            n_hard.astype(jnp.float32), 1.0)

    def mean_topk(_):
        k = max(min(n_min, P), 1)
        top_vals, _ = jax.lax.top_k(loss, k)
        return jnp.mean(top_vals)

    return jax.lax.cond(n_hard > n_min, mean_hard, mean_topk, operand=None)


class WeightedOhemCELoss:
    """JAX/Pallas port of the PyTorch WeightedOhemCELoss module (forward only)."""

    def __init__(self, thresh, n_min, num_classes, ignore_lb=255, *args, **kwargs):
        self.thresh = float(-jnp.log(jnp.float32(thresh)))   # -log(p_thresh), as in the PyTorch ctor
        self.n_min = int(n_min)
        self.num_classes = int(num_classes)
        self.ignore_lb = int(ignore_lb)

    def forward(self, logits, labels):
        return _weighted_ohem_forward(
            logits, labels,
            thresh=self.thresh, n_min=self.n_min,
            num_classes=self.num_classes, ignore_lb=self.ignore_lb)

    __call__ = forward


def _reference_forward(logits, labels, thresh_prob, n_min, num_classes, ignore_lb):
    """Pure-JAX reference mirroring the PyTorch forward (full sort)."""
    w = enet_weighing(labels, num_classes)
    logp = jax.nn.log_softmax(logits.astype(jnp.float32), axis=1)       # (N,C,H,W)
    valid = labels != ignore_lb
    tc = jnp.where(valid, labels, 0).astype(jnp.int32)
    logp_t = jnp.take_along_axis(logp, tc[:, None], axis=1)[:, 0]       # (N,H,W)
    loss = jnp.where(valid, -w[tc] * logp_t, 0.0).reshape(-1)
    loss_sorted = -jnp.sort(-loss)                                      # descending
    th = -jnp.log(jnp.float32(thresh_prob))
    hard = loss_sorted > th
    mean_hard = jnp.sum(jnp.where(hard, loss_sorted, 0.0)) / jnp.maximum(jnp.sum(hard), 1)
    mean_topk = jnp.mean(loss_sorted[:n_min])
    return jnp.where(loss_sorted[n_min] > th, mean_hard, mean_topk)


if __name__ == "__main__":
    key = jax.random.PRNGKey(0)
    k1, k2, k3 = jax.random.split(key, 3)

    N, C, H, W = 2, 4, 16, 16
    ignore_lb = 255
    n_min = 128
    thresh_prob = 0.7

    logits = jax.random.normal(k1, (N, C, H, W), dtype=jnp.float32)
    labels = jax.random.randint(k2, (N, H, W), 0, C).astype(jnp.int32)
    ignore_mask = jax.random.uniform(k3, (N, H, W)) < 0.1
    labels = jnp.where(ignore_mask, jnp.int32(ignore_lb), labels)

    loss_fn = WeightedOhemCELoss(thresh=thresh_prob, n_min=n_min,
                                 num_classes=C, ignore_lb=ignore_lb)
    out = jax.block_until_ready(loss_fn(logits, labels))
    ref = jax.block_until_ready(
        _reference_forward(logits, labels, thresh_prob, n_min, C, ignore_lb))

    assert out.shape == ()
    assert bool(jnp.isfinite(out))
    assert abs(float(out) - float(ref)) <= 1e-3 * (1.0 + abs(float(ref))), (float(out), float(ref))
    print("KERNEL_OK")
</pallas_src>

<mosaic_0001>
module attributes {stable_mosaic.version = 11 : i64} {
  func.func private @main(%arg0: i32) attributes {dimension_semantics = [#tpu.dimension_semantics<core_parallel>], iteration_bounds = array<i64: 2>, tpu.core_type = #tpu.core_type<sc_scalar_subcore>, window_params = []} {
    return
  }
}

module attributes {stable_mosaic.version = 11 : i64} {
  func.func private @main(%arg0: i32) attributes {dimension_semantics = [#tpu.dimension_semantics<core_parallel>], iteration_bounds = array<i64: 2>, tpu.core_type = #tpu.core_type<sc_scalar_subcore>, window_params = []} {
    return
  }
}

module attributes {stable_mosaic.version = 11 : i64} {
  func.func @_weighted_ce_kernel(%arg0: i32, %arg1: i32, %arg2: memref<4xf32, #tpu.memory_space<smem>>, %arg3: memref<1x4x2x128xf32, #tpu.memory_space<vmem>>, %arg4: memref<1x2x128xi32, #tpu.memory_space<vmem>>, %arg5: memref<1x2x128xf32, #tpu.memory_space<vmem>>) attributes {dimension_semantics = [#tpu.dimension_semantics<parallel>, #tpu.dimension_semantics<parallel>], iteration_bounds = array<i64: 2, 1>, scalar_prefetch = 0 : i64, scratch_operands = 0 : i64, tpu.core_type = #tpu.core_type<tc>, window_params = [{transform_indices = @transform_0, window_bounds = array<i64: 4>}, {transform_indices = @transform_1, window_bounds = array<i64: 1, 4, 2, 128>}, {transform_indices = @transform_2, window_bounds = array<i64: 1, 2, 128>}, {transform_indices = @transform_3, window_bounds = array<i64: 1, 2, 128>}]} {
    %c0 = arith.constant 0 : index
    %c0_0 = arith.constant 0 : index
    %c0_1 = arith.constant 0 : index
    %0 = vector.load %arg4[%c0, %c0_0, %c0_1] : memref<1x2x128xi32, #tpu.memory_space<vmem>>, vector<1x2x128xi32>
    %1 = vector.shape_cast %0 : vector<1x2x128xi32> to vector<2x128xi32>
    %c0_2 = arith.constant 0 : index
    %c0_3 = arith.constant 0 : index
    %c0_4 = arith.constant 0 : index
    %c0_5 = arith.constant 0 : index
    %2 = vector.load %arg3[%c0_2, %c0_3, %c0_4, %c0_5] : memref<1x4x2x128xf32, #tpu.memory_space<vmem>>, vector<1x1x2x128xf32>
    %3 = vector.shape_cast %2 : vector<1x1x2x128xf32> to vector<2x128xf32>
    %c0_6 = arith.constant 0 : index
    %c1 = arith.constant 1 : index
    %c0_7 = arith.constant 0 : index
    %c0_8 = arith.constant 0 : index
    %4 = vector.load %arg3[%c0_6, %c1, %c0_7, %c0_8] : memref<1x4x2x128xf32, #tpu.memory_space<vmem>>, vector<1x1x2x128xf32>
    %5 = vector.shape_cast %4 : vector<1x1x2x128xf32> to vector<2x128xf32>
    %6 = arith.maximumf %3, %5 : vector<2x128xf32>
    %c0_9 = arith.constant 0 : index
    %c2 = arith.constant 2 : index
    %c0_10 = arith.constant 0 : index
    %c0_11 = arith.constant 0 : index
    %7 = vector.load %arg3[%c0_9, %c2, %c0_10, %c0_11] : memref<1x4x2x128xf32, #tpu.memory_space<vmem>>, vector<1x1x2x128xf32>
    %8 = vector.shape_cast %7 : vector<1x1x2x128xf32> to vector<2x128xf32>
    %9 = arith.maximumf %6, %8 : vector<2x128xf32>
    %c0_12 = arith.constant 0 : index
    %c3 = arith.constant 3 : index
    %c0_13 = arith.constant 0 : index
    %c0_14 = arith.constant 0 : index
    %10 = vector.load %arg3[%c0_12, %c3, %c0_13, %c0_14] : memref<1x4x2x128xf32, #tpu.memory_space<vmem>>, vector<1x1x2x128xf32>
    %11 = vector.shape_cast %10 : vector<1x1x2x128xf32> to vector<2x128xf32>
    %12 = arith.maximumf %9, %11 : vector<2x128xf32>
    %cst = arith.constant 0.000000e+00 : f32
    %13 = vector.broadcast %cst : f32 to vector<2x128xf32>
    %cst_15 = arith.constant 0.000000e+00 : f32
    %14 = vector.broadcast %cst_15 : f32 to vector<2x128xf32>
    %cst_16 = arith.constant 0.000000e+00 : f32
    %15 = vector.broadcast %cst_16 : f32 to vector<2x128xf32>
    %c0_17 = arith.constant 0 : index
    %c0_18 = arith.constant 0 : index
    %c0_19 = arith.constant 0 : index
    %c0_20 = arith.constant 0 : index
    %16 = vector.load %arg3[%c0_17, %c0_18, %c0_19, %c0_20] : memref<1x4x2x128xf32, #tpu.memory_space<vmem>>, vector<1x1x2x128xf32>
    %17 = vector.shape_cast %16 : vector<1x1x2x128xf32> to vector<2x128xf32>
    %18 = arith.subf %17, %12 : vector<2x128xf32>
    %19 = math.exp %18 : vector<2x128xf32>
    %20 = arith.addf %13, %19 : vector<2x128xf32>
    %c0_i32 = arith.constant 0 : i32
    %21 = vector.broadcast %c0_i32 : i32 to vector<2x128xi32>
    %22 = arith.cmpi eq, %1, %21 : vector<2x128xi32>
    %23 = arith.select %22, %17, %14 : vector<2x128xi1>, vector<2x128xf32>
    %c0_21 = arith.constant 0 : index
    %24 = memref.load %arg2[%c0_21] : memref<4xf32, #tpu.memory_space<smem>>
    %25 = vector.broadcast %24 : f32 to vector<2x128xf32>
    %26 = arith.select %22, %25, %15 : vector<2x128xi1>, vector<2x128xf32>
    %c0_22 = arith.constant 0 : index
    %c1_23 = arith.constant 1 : index
    %c0_24 = arith.constant 0 : index
    %c0_25 = arith.constant 0 : index
    %27 = vector.load %arg3[%c0_22, %c1_23, %c0_24, %c0_25] : memref<1x4x2x128xf32, #tpu.memory_space<vmem>>, vector<1x1x2x128xf32>
    %28 = vector.shape_cast %27 : vector<1x1x2x128xf32> to vector<2x128xf32>
    %29 = arith.subf %28, %12 : vector<2x128xf32>
    %30 = math.exp %29 : vector<2x128xf32>
    %31 = arith.addf %20, %30 : vector<2x128xf32>
    %c1_i32 = arith.constant 1 : i32
    %32 = vector.broadcast %c1_i32 : i32 to vector<2x128xi32>
    %33 = arith.cmpi eq, %1, %32 : vector<2x128xi32>
    %34 = arith.select %33, %28, %23 : vector<2x128xi1>, vector<2x128xf32>
    %c1_26 = arith.constant 1 : index
    %35 = memref.load %arg2[%c1_26] : memref<4xf32, #tpu.memory_space<smem>>
    %36 = vector.broadcast %35 : f32 to vector<2x128xf32>
    %37 = arith.select %33, %36, %26 : vector<2x128xi1>, vector<2x128xf32>
    %c0_27 = arith.constant 0 : index
    %c2_28 = arith.constant 2 : index
    %c0_29 = arith.constant 0 : index
    %c0_30 = arith.constant 0 : index
    %38 = vector.load %arg3[%c0_27, %c2_28, %c0_29, %c0_30] : memref<1x4x2x128xf32, #tpu.memory_space<vmem>>, vector<1x1x2x128xf32>
    %39 = vector.shape_cast %38 : vector<1x1x2x128xf32> to vector<2x128xf32>
    %40 = arith.subf %39, %12 : vector<2x128xf32>
    %41 = math.exp %40 : vector<2x128xf32>
    %42 = arith.addf %31, %41 : vector<2x128xf32>
    %c2_i32 = arith.constant 2 : i32
    %43 = vector.broadcast %c2_i32 : i32 to vector<2x128xi32>
    %44 = arith.cmpi eq, %1, %43 : vector<2x128xi32>
    %45 = arith.select %44, %39, %34 : vector<2x128xi1>, vector<2x128xf32>
    %c2_31 = arith.constant 2 : index
    %46 = memref.load %arg2[%c2_31] : memref<4xf32, #tpu.memory_space<smem>>
    %47 = vector.broadcast %46 : f32 to vector<2x128xf32>
    %48 = arith.select %44, %47, %37 : vector<2x128xi1>, vector<2x128xf32>
    %c0_32 = arith.constant 0 : index
    %c3_33 = arith.constant 3 : index
    %c0_34 = arith.constant 0 : index
    %c0_35 = arith.constant 0 : index
    %49 = vector.load %arg3[%c0_32, %c3_33, %c0_34, %c0_35] : memref<1x4x2x128xf32, #tpu.memory_space<vmem>>, vector<1x1x2x128xf32>
    %50 = vector.shape_cast %49 : vector<1x1x2x128xf32> to vector<2x128xf32>
    %51 = arith.subf %50, %12 : vector<2x128xf32>
    %52 = math.exp %51 : vector<2x128xf32>
    %53 = arith.addf %42, %52 : vector<2x128xf32>
    %c3_i32 = arith.constant 3 : i32
    %54 = vector.broadcast %c3_i32 : i32 to vector<2x128xi32>
    %55 = arith.cmpi eq, %1, %54 : vector<2x128xi32>
    %56 = arith.select %55, %50, %45 : vector<2x128xi1>, vector<2x128xf32>
    %c3_36 = arith.constant 3 : index
    %57 = memref.load %arg2[%c3_36] : memref<4xf32, #tpu.memory_space<smem>>
    %58 = vector.broadcast %57 : f32 to vector<2x128xf32>
    %59 = arith.select %55, %58, %48 : vector<2x128xi1>, vector<2x128xf32>
    %60 = arith.subf %12, %56 : vector<2x128xf32>
    %61 = math.log %53 : vector<2x128xf32>
    %62 = arith.addf %60, %61 : vector<2x128xf32>
    %63 = arith.mulf %59, %62 : vector<2x128xf32>
    %c0_37 = arith.constant 0 : index
    %c0_38 = arith.constant 0 : index
    %c0_39 = arith.constant 0 : index
    %64 = vector.load %arg5[%c0_37, %c0_38, %c0_39] : memref<1x2x128xf32, #tpu.memory_space<vmem>>, vector<1x2x128xf32>
    %65 = vector.shape_cast %64 : vector<1x2x128xf32> to vector<2x128xf32>
    %66 = vector.shape_cast %63 : vector<2x128xf32> to vector<1x2x128xf32>
    tpu.vector_store %arg5[%c0_37, %c0_38, %c0_39], %66 {strides = array<i32>} : memref<1x2x128xf32, #tpu.memory_space<vmem>>, vector<1x2x128xf32>,
    return
  }
  func.func @transform_0(%arg0: i32, %arg1: i32) -> i32 {
    %c0_i32 = arith.constant 0 : i32
    %c0_i32_0 = arith.constant 0 : i32
    return %c0_i32 : i32
  }
  func.func @transform_1(%arg0: i32, %arg1: i32) -> (i32, i32, i32, i32) {
    %c0_i32 = arith.constant 0 : i32
    %c0_i32_0 = arith.constant 0 : i32
    %c0_i32_1 = arith.constant 0 : i32
    return %arg0, %c0_i32, %arg1, %c0_i32_0 : i32, i32, i32, i32
  }
  func.func @transform_2(%arg0: i32, %arg1: i32) -> (i32, i32, i32) {
    %c0_i32 = arith.constant 0 : i32
    %c0_i32_0 = arith.constant 0 : i32
    return %arg0, %arg1, %c0_i32 : i32, i32, i32
  }
  func.func @transform_3(%arg0: i32, %arg1: i32) -> (i32, i32, i32) {
    %c0_i32 = arith.constant 0 : i32
    %c0_i32_0 = arith.constant 0 : i32
    return %arg0, %arg1, %c0_i32 : i32, i32, i32
  }
}

</mosaic_0001>

<bundles_post_ra>
// kernel: _weighted_ohem_forward.1
= control target key start
LH: loop header
LB: loop body
LE: loop exit
PB: predicated region body
PF: predicated region fallthrough
CT: control target
= control target key end

     0   :  { %8 = vsyncpa [#allocation3], 0  ;;  %s529_s12 = smov 0   ;;  %s531_s13 = smov 0   ;;  %s599_s0 = inlined_call_operand.vmem [shape: f32[4], index: 0, kind: input, shape index: {}]   ;;  %s600_s1 = inlined_call_operand.vmem [shape: f32[2,4,2,128], index: 1, kind: input, shape index: {}]   ;;  %s601_s2 = inlined_call_operand.vmem [shape: s32[2,2,128], index: 2, kind: input, shape index: {}]   ;;  %s602_s3 = inlined_call_operand.vmem [shape: f32[2,2,128], index: 3, kind: output, shape index: {}]  }
   0x1   :  { %s533_s14 = smov 0  }
   0x2 LB: > { %s400_s15 = sadd.s32 4294967295, %s506_s14   ;;  %s26_s16 = sadd.s32 1, %s502_s13  ;;  %s506_s14 = sphi %s533_s14, %s14_s14   ;;  %s502_s13 = sphi %s531_s13, %s606_s13   ;;  %s498_s12 = sphi %s529_s12, %s605_s12  }
   0x3   : > { %p28_p0 = scmp.ge.s32.totalorder %s26_s16, 2  ;;  %p402_p1 = scmp.ge.s32.totalorder %s506_s14, 1 }
   0x4   : > { %p136_p2 = scmp.lt.s32.totalorder %s506_s14, 3  ;;  %p554_p4 = scmp.eq.s32.totalorder %s400_s15, 0 }
   0x5   : > { %s608_s16 = smov (%p28_p0, %s26_s16), 0  ;;  %s149_s21 = sshll.u32 %s599_s0, 4  ;;  %s150_s21 = int_to_ptr.vmem [resolvable:$true] %s149_s21 }
   0x6   : > { %p550_p3 = pnand %p402_p1, %p136_p2  ;;  %s465_s22 = scalar_lea.vmem %s150_s21, 16 }
   0x7   : > { %p466_p7 = scmp.ne.s32.totalorder %s150_s21, %s465_s22  ;;  %p473_p11 = scmp.lt.s32.totalorder %s150_s21, %s150_s21 }
   0x8   : > { %p424_p5 = pneg %p550_p3  ;;  %p474_p12 = scmp.lt.s32.totalorder %s465_s22, %s465_s22 }
   0xa   : > { %p425_p6 = pnand %p554_p4, %p424_p5  ;;  %p475_p13 = por %p474_p12, %p473_p11 }
   0xc   : > { %p467_p8 = pneg %p425_p6 }
   0xe   : > { %p468_p9 = pnand %p467_p8, %p466_p7 }
  0x10   : > { %p469_p10 = pneg %p468_p9 }
  0x12   : > { %p476_p0 = pnand %p475_p13, %p469_p10 }
  0x14   : > { %479 = shalt.err (!%p476_p0)
}
  0x15   : > { %s508_s23 = smov [#allocation2]   ;;  %183 = sbr.rel (%p550_p3) target bundleno = 87 (0x57), region = 32 }
  0x16   : > { %427 = dma.vmem_to_smem (!%p425_p6), %s150_s21, 16, %s508_s23, [#allocation3]  }
  0x1a   : > { %493 = dma.done.wait (%p554_p4), [#allocation3], 16  }
  0x1b   : > { %495 = vsyncadd (%p554_p4), [#allocation3], 4294967280 }
  0x1c   : > { %189 = sfence }
  0x1d   : > { %p220_p1 = scmp.lt.s32.totalorder %s498_s12, 1  ;;  %s259_s5 = sld [smem:[#allocation2]] }
  0x1e   : > { %s414_s6 = sld [smem:[#allocation2 + $0x1]] }
  0x1f   : > { %s610_s12 = smov (!%p220_p1, %s498_s12), 1  ;;  %s415_s7 = sld [smem:[#allocation2 + $0x2]] }
  0x20   : > { %s419_s24 = sshll.u32 %s610_s12, 3  ;;  %s409_s28 = sshll.u32 %s610_s12, 1 }
  0x21   : > { %s227_s27 = scalar_lea.vmem %s600_s1, %s419_s24  ;;  %s234_s4 = scalar_lea.vmem %s601_s2, %s409_s28 }
  0x22   : > { %v243_v0 = vld [vmem:[%s227_s27] sm:$0x3]  ;;  %v411_v1 = vld [vmem:[%s227_s27 + $0x2] sm:$0x3]  ;;  %v412_v3 = vld [vmem:[%s227_s27 + $0x4] sm:$0x3]  ;;  %s241_s11 = scalar_lea.vmem %s602_s3, %s409_s28 }
  0x23   : > { %v246_v2 = vmax.f32 %v243_v0, %v411_v1  ;;  %v413_v4 = vld [vmem:[%s227_s27 + $0x6] sm:$0x3]  ;;  %v242_v18 = vld [vmem:[%s234_s4] sm:$0x3]  ;;  %v260_v24 = vstv %s259_s5  ;;  %s416_s8 = sld [smem:[#allocation2 + $0x3]] }
  0x24   : > { %vm257_vm0 = vcmp.eq.s32.totalorder %v242_v18, 0  ;;  %vm266_vm1 = vcmp.eq.s32.totalorder %v242_v18, 1  ;;  %vm275_vm2 = vcmp.eq.s32.totalorder %v242_v18, 2  ;;  %v269_v27 = vstv %s414_s6 }
  0x25   : > { %v249_v5 = vmax.f32 %v246_v2, %v412_v3  ;;  %v258_v23 = vsel %vm257_vm0, %v243_v0, 0.0  ;;  %v261_v26 = vsel %vm257_vm0, %v260_v24, 0.0  ;;  %vm284_vm3 = vcmp.eq.s32.totalorder %v242_v18, 3 }
  0x26   : > { %v267_v25 = vsel %vm266_vm1, %v411_v1, %v258_v23  ;;  %v270_v29 = vsel %vm266_vm1, %v269_v27, %v261_v26  ;;  %v278_v30 = vstv %s415_s7 }
  0x27   : > { %v252_v6 = vmax.f32 %v249_v5, %v413_v4  ;;  %v276_v28 = vsel %vm275_vm2, %v412_v3, %v267_v25  ;;  %v279_v32 = vsel %vm275_vm2, %v278_v30, %v270_v29 }
  0x28   : > { %v285_v31 = vsel %vm284_vm3, %v413_v4, %v276_v28 }
  0x29   : > { %v253_v7 = vsub.f32 %v243_v0, %v252_v6  ;;  %v262_v8 = vsub.f32 %v411_v1, %v252_v6  ;;  %v271_v9 = vsub.f32 %v412_v3, %v252_v6  ;;  %v280_v10 = vsub.f32 %v413_v4, %v252_v6 }
  0x2a   : > { %v287_v33 = vstv %s416_s8  ;;  %v289_v34 = vsub.f32 %v252_v6, %v285_v31 }
  0x2b   : > { %v254_v11 = vmul.f32 1.442695, %v253_v7  ;;  %v263_v12 = vmul.f32 1.442695, %v262_v8  ;;  %v272_v13 = vmul.f32 1.442695, %v271_v9  ;;  %v288_v37 = vsel %vm284_vm3, %v287_v33, %v279_v32 }
  0x2c   : > { %v281_v14 = vmul.f32 1.442695, %v280_v10 }
  0x2d   : > { %455 = vpow2.f32 %v254_v11 }
  0x2e   : > { %457 = vpow2.f32 %v263_v12 }
  0x2f   : > { %459 = vpow2.f32 %v272_v13 }
  0x30   : > { %461 = vpow2.f32 %v281_v14 }
  0x3a   : > { %v456_v15 = vpop.eup %455 }
  0x3b   : > { %v458_v16 = vpop.eup %457 }
  0x3c   : > { %v460_v17 = vpop.eup %459  ;;  %v265_v19 = vadd.f32 %v458_v16, %v456_v15 }
  0x3d   : > { %v462_v20 = vpop.eup %461 }
  0x3e   : > { %v274_v21 = vadd.f32 %v460_v17, %v265_v19 }
  0x40   : > { %v283_v22 = vadd.f32 %v462_v20, %v274_v21 }
  0x42   : > { %463 = vlog2.f32 %v283_v22 }
  0x4f   : > { %v464_v35 = vpop.eup %463 }
  0x50   : > { %v291_v36 = vmul.f32 0.6931472, %v464_v35 }
  0x52   : > { %v292_v38 = vadd.f32 %v291_v36, %v289_v34 }
  0x54   : > { %v293_v39 = vmul.f32 %v292_v38, %v288_v37 }
  0x56   : > { %294 = vst [vmem:[%s241_s11] sm:$0x3] %v293_v39 }
  0x57 PF: > { %s14_s14 = sadd.s32 1, %s506_s14   ;;  %s605_s12 = smov %s502_s13 }
  0x58   : > { %p11_p2 = scmp.ge.s32.totalorder %s14_s14, 4   ;;  %s606_s13 = smov %s608_s16 }
  0x5a   :  { %13 = sbr.rel (!%p11_p2) target bundleno = 2 (0x2), region = 73 }
  0x5f   :  { %320 = vsyncpa [#allocation3], 1 }
  0x60   :  { %322 = vsyncpa [#allocation3 + $0x1], 1 }

</bundles_post_ra>
